<compile_context>
chip_gen: v7x
topology: tpu7x:2x2x1
jax: 0.10.0
libtpu: 0.0.40
codegen_flags: <defaults>
</compile_context>

<pallas_src>
import functools

import jax
import jax.numpy as jnp
from jax import lax
from jax.experimental import pallas as pl
from jax.experimental.pallas import tpu as pltpu


def _logit_norm_ce_kernel(x_ref, tgt_ref, out_ref, *, t, n_total, tile_n):
    i = pl.program_id(0)

    x = x_ref[...].astype(jnp.float32)                # (tile_n, C) f32
    tgt = tgt_ref[...]                                # (tile_n, 1) int32
    c = x.shape[1]

    # --- single fused pass over the tile: sum(x^2), row max, target gather ---
    ss = jnp.sum(x * x, axis=-1, keepdims=True)       # (tile_n, 1)
    max_x = jnp.max(x, axis=-1, keepdims=True)        # (tile_n, 1)
    col = lax.broadcasted_iota(jnp.int32, (1, c), 1)  # (1, C); broadcasts vs tgt
    tgt_x = jnp.sum(jnp.where(col == tgt, x, 0.0), axis=-1, keepdims=True)

    # PyTorch adds 1e-7 to the *norm*; one exact per-row reciprocal (EUP) +
    # one full-tile multiply replaces the two (N, C) divisions.
    norms = jnp.sqrt(ss) + 1e-7
    inv = pl.reciprocal(norms * t, approx=False)      # (tile_n, 1)

    # Stable log-sum-exp of x*inv without materializing z = x*inv:
    #   lse = log(sum(exp((x - max_x) * inv))) + max_x * inv
    e = jnp.exp((x - max_x) * inv)                    # (tile_n, C) only full-tile temp
    lse = jnp.log(jnp.sum(e, axis=-1, keepdims=True)) + max_x * inv

    per_example = lse - tgt_x * inv                   # -log_softmax(x*inv)[target]

    # Mask rows past the true batch size (partial last block reads pad data);
    # keep this per-row mask BEFORE the block sum.
    row = lax.broadcasted_iota(jnp.int32, per_example.shape, 0) + i * tile_n
    per_example = jnp.where(row < n_total, per_example, 0.0)

    partial = jnp.sum(per_example)                    # scalar partial loss sum
    out_ref[...] = jnp.broadcast_to(partial, out_ref.shape)


def _choose_tile_n(n, c, dtype):
    """Batch tile: ~4 MiB of logits, aligned to dtype sublane packing, >=2 blocks for big N."""
    itemsize = jnp.dtype(dtype).itemsize
    # Native sublane packing: f32 -> 8 rows, bf16 -> 16, int8/fp8 -> 32.
    align = max(8, 8 * (4 // max(1, itemsize)))
    target_bytes = 4 * 1024 * 1024
    t = (target_bytes // max(1, c * itemsize)) // align * align
    t = max(align, min(t, 2048))
    if n <= align:
        return n                     # single block covering the full batch
    if n <= t:
        # Batch fits in one block.  On v7x the "parallel" grid axis is
        # megacore-sharded, so once the batch is big enough split into >=2
        # blocks to keep both TensorCores busy.
        if n > 512:
            half = -(-n // 2)
            return (-(-half // align)) * align
        return n
    return int(t)


def logit_norm_loss(x, target, t=1.0, tile_n=None):
    """x: (N, C) float32/bfloat16 logits, target: (N,) int labels. Returns scalar f32."""
    n, c = x.shape
    itemsize = jnp.dtype(x.dtype).itemsize
    if tile_n is None:
        tile_n = _choose_tile_n(n, c, x.dtype)
    num_blocks = pl.cdiv(n, tile_n)

    tgt2d = target.astype(jnp.int32).reshape(n, 1)

    kernel = functools.partial(
        _logit_norm_ce_kernel, t=float(t), n_total=n, tile_n=tile_n
    )

    # VMEM budget: 2 pipeline buffers for the x block + a handful of f32
    # full-tile temporaries (upcast, exp term, masks) + slack.  Capped at
    # 48 MiB so it stays inside v7x's 64 MiB physical VMEM.
    block_bytes = tile_n * c * itemsize
    vmem_limit = 2 * block_bytes + 8 * tile_n * c * 4 + (2 << 20)
    vmem_limit = int(min(max(vmem_limit, 16 * 1024 * 1024), 48 * 1024 * 1024))

    cost = pl.CostEstimate(
        flops=8 * n * c,
        transcendentals=n * c,        # exp per element (+ per-row log/sqrt/recip)
        bytes_accessed=n * c * itemsize + n * 4 + num_blocks * 8 * 128 * 4,
    )

    partials = pl.pallas_call(
        kernel,
        out_shape=jax.ShapeDtypeStruct((num_blocks, 8, 128), jnp.float32),
        grid_spec=pltpu.PrefetchScalarGridSpec(
            num_scalar_prefetch=0,
            grid=(num_blocks,),
            in_specs=[
                pl.BlockSpec((tile_n, c), lambda i: (i, 0)),   # logits tile
                pl.BlockSpec((tile_n, 1), lambda i: (i, 0)),   # targets (tiny)
            ],
            out_specs=pl.BlockSpec((1, 8, 128), lambda i: (i, 0, 0)),
        ),
        compiler_params=pltpu.CompilerParams(
            dimension_semantics=("parallel",),   # independent blocks -> megacore
            vmem_limit_bytes=vmem_limit,
        ),
        cost_estimate=cost,
    )(x, tgt2d)

    # Final reduction over per-block partial sums; divide by the true N.
    return jnp.sum(partials[:, 0, 0]) / n


def _reference(x, target, t):
    xf = x.astype(jnp.float32)
    norms = jnp.linalg.norm(xf, axis=-1, keepdims=True) + 1e-7
    z = xf / norms / t
    logp = jax.nn.log_softmax(z, axis=-1)
    return -jnp.mean(jnp.take_along_axis(logp, target[:, None], axis=-1))


if __name__ == "__main__":
    key = jax.random.PRNGKey(0)
    kx, kt, kx2, kt2, kx3, kt3 = jax.random.split(key, 6)

    # Case 1: small shape consistent with the module (batch=8, num_classes=32).
    N, C = 8, 32
    x = jax.random.normal(kx, (N, C), dtype=jnp.float32)
    target = jax.random.randint(kt, (N,), 0, C, dtype=jnp.int32)
    loss = logit_norm_loss(x, target, t=1.0)
    jax.block_until_ready(loss)
    ref = _reference(x, target, 1.0)
    assert jnp.allclose(loss, ref, atol=1e-5, rtol=1e-5), (loss, ref)

    # Case 2: multi-block tiling + partial-last-block masking + t != 1
    # (N=20, tile_n=8 -> 3 blocks, last block has 4 valid rows).
    N2, C2 = 20, 32
    x2 = jax.random.normal(kx2, (N2, C2), dtype=jnp.float32)
    target2 = jax.random.randint(kt2, (N2,), 0, C2, dtype=jnp.int32)
    loss2 = logit_norm_loss(x2, target2, t=0.5, tile_n=8)
    jax.block_until_ready(loss2)
    ref2 = _reference(x2, target2, 0.5)
    assert jnp.allclose(loss2, ref2, atol=1e-5, rtol=1e-5), (loss2, ref2)

    # Case 3: bf16 logits (exercises in-kernel f32 upcast + 16-row alignment).
    N3, C3 = 32, 32
    x3 = jax.random.normal(kx3, (N3, C3), dtype=jnp.float32).astype(jnp.bfloat16)
    target3 = jax.random.randint(kt3, (N3,), 0, C3, dtype=jnp.int32)
    loss3 = logit_norm_loss(x3, target3, t=2.0)
    jax.block_until_ready(loss3)
    ref3 = _reference(x3, target3, 2.0)
    assert jnp.allclose(loss3, ref3, atol=1e-4, rtol=1e-4), (loss3, ref3)

    print("KERNEL_OK")
</pallas_src>

<mosaic_0001>
module attributes {stable_mosaic.version = 11 : i64} {
  func.func @_logit_norm_ce_kernel(%arg0: i32, %arg1: memref<8x32xf32, #tpu.memory_space<vmem>>, %arg2: memref<8x1xi32, #tpu.memory_space<vmem>>, %arg3: memref<1x8x128xf32, #tpu.memory_space<vmem>>) attributes {dimension_semantics = [#tpu.dimension_semantics<parallel>], iteration_bounds = array<i64: 1>, scalar_prefetch = 0 : i64, scratch_operands = 0 : i64, tpu.core_type = #tpu.core_type<tc>, window_params = [{transform_indices = @transform_0, window_bounds = array<i64: 8, 32>}, {transform_indices = @transform_1, window_bounds = array<i64: 8, 1>}, {transform_indices = @transform_2, window_bounds = array<i64: 1, 8, 128>}]} {
    %c0 = arith.constant 0 : index
    %c0_0 = arith.constant 0 : index
    %0 = vector.load %arg1[%c0, %c0_0] : memref<8x32xf32, #tpu.memory_space<vmem>>, vector<8x32xf32>
    %c0_1 = arith.constant 0 : index
    %c0_2 = arith.constant 0 : index
    %1 = vector.load %arg2[%c0_1, %c0_2] : memref<8x1xi32, #tpu.memory_space<vmem>>, vector<8x1xi32>
    %2 = arith.mulf %0, %0 : vector<8x32xf32>
    %cst = arith.constant dense<0.000000e+00> : vector<8xf32>
    %3 = vector.multi_reduction <add>, %2, %cst [1] : vector<8x32xf32> to vector<8xf32>
    %4 = vector.shape_cast %3 : vector<8xf32> to vector<8x1xf32>
    %cst_3 = arith.constant dense<0xFF800000> : vector<8xf32>
    %5 = vector.multi_reduction <maximumf>, %0, %cst_3 [1] : vector<8x32xf32> to vector<8xf32>
    %6 = vector.shape_cast %5 : vector<8xf32> to vector<8x1xf32>
    %7 = tpu.iota {dimensions = array<i32: 1>} : vector<1x32xi32>
    %8 = vector.broadcast %7 : vector<1x32xi32> to vector<8x32xi32>
    %9 = vector.broadcast %1 : vector<8x1xi32> to vector<8x32xi32>
    %10 = arith.cmpi eq, %8, %9 : vector<8x32xi32>
    %cst_4 = arith.constant 0.000000e+00 : f32
    %11 = vector.broadcast %cst_4 : f32 to vector<8x32xf32>
    %12 = arith.select %10, %0, %11 : vector<8x32xi1>, vector<8x32xf32>
    %cst_5 = arith.constant dense<0.000000e+00> : vector<8xf32>
    %13 = vector.multi_reduction <add>, %12, %cst_5 [1] : vector<8x32xf32> to vector<8xf32>
    %14 = vector.shape_cast %13 : vector<8xf32> to vector<8x1xf32>
    %15 = math.sqrt %4 : vector<8x1xf32>
    %cst_6 = arith.constant 1.000000e-07 : f32
    %16 = vector.broadcast %cst_6 : f32 to vector<8x1xf32>
    %17 = arith.addf %15, %16 : vector<8x1xf32>
    %cst_7 = arith.constant 1.000000e+00 : f32
    %18 = vector.broadcast %cst_7 : f32 to vector<8x1xf32>
    %19 = arith.mulf %17, %18 : vector<8x1xf32>
    %20 = tpu.reciprocal %19 : vector<8x1xf32> -> vector<8x1xf32>
    %21 = vector.broadcast %6 : vector<8x1xf32> to vector<8x32xf32>
    %22 = arith.subf %0, %21 : vector<8x32xf32>
    %23 = vector.broadcast %20 : vector<8x1xf32> to vector<8x32xf32>
    %24 = arith.mulf %22, %23 : vector<8x32xf32>
    %25 = math.exp %24 : vector<8x32xf32>
    %cst_8 = arith.constant dense<0.000000e+00> : vector<8xf32>
    %26 = vector.multi_reduction <add>, %25, %cst_8 [1] : vector<8x32xf32> to vector<8xf32>
    %27 = vector.shape_cast %26 : vector<8xf32> to vector<8x1xf32>
    %28 = math.log %27 : vector<8x1xf32>
    %29 = arith.mulf %6, %20 : vector<8x1xf32>
    %30 = arith.addf %28, %29 : vector<8x1xf32>
    %31 = arith.mulf %14, %20 : vector<8x1xf32>
    %32 = arith.subf %30, %31 : vector<8x1xf32>
    %33 = tpu.iota {dimensions = array<i32: 0>} : vector<8x1xi32>
    %c8_i32 = arith.constant 8 : i32
    %34 = arith.muli %arg0, %c8_i32 : i32
    %35 = vector.broadcast %34 : i32 to vector<8x1xi32>
    %36 = arith.addi %33, %35 : vector<8x1xi32>
    %c8_i32_9 = arith.constant 8 : i32
    %37 = vector.broadcast %c8_i32_9 : i32 to vector<8x1xi32>
    %38 = arith.cmpi slt, %36, %37 : vector<8x1xi32>
    %cst_10 = arith.constant 0.000000e+00 : f32
    %39 = vector.broadcast %cst_10 : f32 to vector<8x1xf32>
    %40 = arith.select %38, %32, %39 : vector<8x1xi1>, vector<8x1xf32>
    %41 = vector.shape_cast %40 : vector<8x1xf32> to vector<1x8x1xf32>
    %cst_11 = arith.constant dense<0.000000e+00> : vector<1xf32>
    %42 = vector.multi_reduction <add>, %41, %cst_11 [1, 2] : vector<1x8x1xf32> to vector<1xf32>
    %43 = vector.shape_cast %42 : vector<1xf32> to vector<1x1x1xf32>
    %44 = vector.extract %43[0, 0, 0] : f32 from vector<1x1x1xf32>
    %45 = vector.broadcast %44 : f32 to vector<1x8x128xf32>
    %c0_12 = arith.constant 0 : index
    %c0_13 = arith.constant 0 : index
    %c0_14 = arith.constant 0 : index
    %46 = vector.load %arg3[%c0_12, %c0_13, %c0_14] : memref<1x8x128xf32, #tpu.memory_space<vmem>>, vector<1x8x128xf32>
    tpu.vector_store %arg3[%c0_12, %c0_13, %c0_14], %45 {strides = array<i32>} : memref<1x8x128xf32, #tpu.memory_space<vmem>>, vector<1x8x128xf32>,
    return
  }
  func.func @transform_0(%arg0: i32) -> (i32, i32) {
    %c0_i32 = arith.constant 0 : i32
    %c0_i32_0 = arith.constant 0 : i32
    return %arg0, %c0_i32 : i32, i32
  }
  func.func @transform_1(%arg0: i32) -> (i32, i32) {
    %c0_i32 = arith.constant 0 : i32
    %c0_i32_0 = arith.constant 0 : i32
    return %arg0, %c0_i32 : i32, i32
  }
  func.func @transform_2(%arg0: i32) -> (i32, i32, i32) {
    %c0_i32 = arith.constant 0 : i32
    %c0_i32_0 = arith.constant 0 : i32
    %c0_i32_1 = arith.constant 0 : i32
    return %arg0, %c0_i32, %c0_i32_0 : i32, i32, i32
  }
}

</mosaic_0001>

<bundles_post_ra>
// kernel: tpu_custom_call.1
= control target key start
LH: loop header
LB: loop body
LE: loop exit
PB: predicated region body
PF: predicated region fallthrough
CT: control target
= control target key end

     0   :  { %vm15_vm0 = vcmask 261120   ;;  %s165_s0 = inlined_call_operand.vmem [shape: f32[8,32], index: 0, kind: input, shape index: {}]   ;;  %s166_s1 = inlined_call_operand.vmem [shape: s32[8,1], index: 1, kind: input, shape index: {}]   ;;  %s167_s2 = inlined_call_operand.hbm [shape: f32[1,8,128], index: 2, kind: output, shape index: {}]  }
   0x1   :  { %v13_v0 = vld [vmem:[%s166_s1] sm:$0xff] }
   0x2   :  { %v12_v1 = vld [vmem:[%s165_s0] sm:$0xff] }
   0x3   :  { %7 = vsyncpa [#allocation3], 0  ;;  %v126_v2 = vmov 0   ;;  %v14_v3 = vmul.f32 %v12_v1, %v12_v1  ;;  %v19_v5 = vsel %vm15_vm0, %v12_v1, -inf  ;;  %v22_v6 = vlaneseq  ;;  %s127_s0 = smov [#allocation2]  }
   0x4   :  { %92 = vset.pattern.permute.xlu1 %v126_v2  ;;  %93 = vset.pattern.permute.xlu0 %v126_v2  ;;  %vm61_vm4 = vcmask 7168   ;;  %s80_s1 = sshll.u32 %s127_s0, 4  ;;  %s81_s1 = int_to_ptr.vmem [resolvable:$true] %s80_s1 }
   0x5   :  { %25 = vperm.xlu1 %92, %v13_v0   ;;  %v16_v4 = vsel %vm15_vm0, %v14_v3, 0.0  ;;  %v23_v7 = vand.u32 127, %v22_v6  ;;  %s102_s14 = scalar_lea.vmem %s81_s1, 128  ;;  %p107_p1 = scmp.lt.s32.totalorder %s81_s1, %s81_s1 }
   0x6   :  { %17 = vadd.xlane.f32.xlu0 %v16_v4  ;;  %p103_p0 = scmp.ne.s32.totalorder %s81_s1, %s102_s14  ;;  %p108_p2 = scmp.lt.s32.totalorder %s102_s14, %s102_s14 }
   0x8   :  { %p109_p3 = por %p108_p2, %p107_p1 }
   0xa   :  { %20 = vmax.xlane.f32.xlu0 %v19_v5  ;;  %p110_p4 = pnand %p109_p3, %p103_p0 }
  0x84   :  { %v26_v8 = vpop.permute.xlu1 %25 }
  0x85   :  { %vm27_vm1 = vcmp.eq.s32.totalorder %v23_v7, %v26_v8 }
  0x86   :  { %v28_v9 = vsel %vm27_vm1, %v12_v1, 0.0 }
  0x87   :  { %v29_v10 = vsel %vm15_vm0, %v28_v9, 0.0 }
  0x88   :  { %30 = vadd.xlane.f32.xlu0 %v29_v10 }
  0x93   :  { %v18_v11 = vpop.xlane.xlu0 %17 }
  0x94   :  { %94 = vrsqrt.f32 %v18_v11  ;;  %vm34_vm2 = vcmp.eq.f32.partialorder %v18_v11, inf  ;;  %v37_v14 = vand.u32 2147483648, %v18_v11  ;;  %vm36_vm3 = vcmp.eq.f32.partialorder %v18_v11, 0.0 }
  0x97   :  { %v21_v18 = vpop.xlane.xlu0 %20 }
  0x98   :  { %v41_v19 = vsub.f32 %v12_v1, %v21_v18 }
  0x9e   :  { %v95_v12 = vpop.eup %94 }
  0x9f   :  { %v33_v13 = vmul.f32 %v95_v12, %v18_v11 }
  0xa1   :  { %v35_v15 = vsel %vm34_vm2, %v18_v11, %v33_v13 }
  0xa2   :  { %v38_v16 = vsel %vm36_vm3, %v37_v14, %v35_v15 }
  0xa3   :  { %v39_v17 = vadd.f32 1e-07, %v38_v16 }
  0xa5   :  { %96 = vrcp.f32 %v39_v17 }
  0xaf   :  { %v97_v20 = vpop.eup %96 }
  0xb0   :  { %v42_v21 = vmul.f32 %v97_v20, %v41_v19  ;;  %v50_v28 = vmul.f32 %v97_v20, %v21_v18 }
  0xb2   :  { %v43_v22 = vmul.f32 1.442695, %v42_v21 }
  0xb4   :  { %98 = vpow2.f32 %v43_v22 }
  0xbe   :  { %v99_v23 = vpop.eup %98 }
  0xbf   :  { %v45_v24 = vsel %vm15_vm0, %v99_v23, 0.0 }
  0xc0   :  { %46 = vadd.xlane.f32.xlu1 %v45_v24 }
 0x115   :  { %v31_v27 = vpop.xlane.xlu0 %30 }
 0x116   :  { %v52_v30 = vmul.f32 %v97_v20, %v31_v27 }
 0x14d   :  { %v47_v25 = vpop.xlane.xlu1 %46 }
 0x14e   :  { %100 = vlog2.f32 %v47_v25 }
 0x158   :  { %v101_v26 = vpop.eup %100 }
 0x159   :  { %v49_v29 = vmul.f32 0.6931472, %v101_v26 }
 0x15b   :  { %v51_v31 = vadd.f32 %v50_v28, %v49_v29 }
 0x15d   :  { %v53_v32 = vsub.f32 %v51_v31, %v52_v30 }
 0x15f   :  { %v62_v33 = vsel %vm61_vm4, %v53_v32, 0.0 }
 0x160   :  { %63 = vadd.xlane.f32.xlu0 %v62_v33 }
 0x1ed   :  { %v64_v34 = vpop.xlane.xlu0 %63 }
 0x1ee   :  { %v65_v35 = vrot.slane %v64_v34, 4 }
 0x1f0   :  { %v66_v36 = vadd.f32 %v65_v35, %v64_v34 }
 0x1f2   :  { %v67_v37 = vrot.slane %v66_v36, 2 }
 0x1f4   :  { %v68_v38 = vadd.f32 %v67_v37, %v66_v36 }
 0x1f6   :  { %v69_v39 = vrot.slane %v68_v38, 1 }
 0x1f8   :  { %v70_v40 = vadd.f32 %v69_v39, %v68_v38 }
 0x1fa   :  { %88 = vpush %v70_v40 }
 0x22b   :  { %s89_s13 = spop %88 }
 0x22c   :  { %v72_v41 = vstv %s89_s13 }
 0x22d   :  { %73 = vst [vmem:[#allocation2] sm:$0xff] %v72_v41 }
 0x22e   :  { %113 = shalt.err (!%p110_p4)
}
 0x22f   :  { %s114_s17 = scalar_lea.hbm %s167_s2, 128 }
 0x230   :  { %p115_p5 = scmp.ne.s32.totalorder %s167_s2, %s114_s17  ;;  %p118_p6 = scmp.lt.u32.totalorder %s114_s17, %s167_s2 }
 0x232   :  { %p120_p7 = pnand %p118_p6, %p115_p5 }
 0x234   :  { %123 = shalt.err (!%p120_p7)
}
 0x235   :  { %83 = dma.vmem_to_hbm [thread:$0]  %s81_s1, 128, %s167_s2, [#allocation3]  }
 0x236   :  { %124 = dma.done.wait [#allocation3], 128  }
 0x237   :  { %125 = vsyncadd [#allocation3], 4294967168 }
 0x238   :  { %87 = vsyncpa [#allocation3], 1 }

</bundles_post_ra>
